<compile_context>
chip_gen: v6e
topology: v6e:2x2x1
jax: 0.10.0
libtpu: 0.0.40
codegen_flags: <defaults>
</compile_context>

<pallas_src>
import jax
import jax.numpy as jnp
from jax.experimental import pallas as pl
from jax.experimental.pallas import tpu as pltpu


# ---------------------------------------------------------------------------
# Synthetic "args" matching the module's __init__ (small shapes).
# ---------------------------------------------------------------------------
class Args:
    N_theta = 2
    N_azimuth = 8
    N_eccentricity = 4
    N_phase = 2
    dim1 = 64
    dim2 = 32
    bias_deconv = True
    bn1_bn_momentum = 0.5   # > 0  -> BN1 active
    bn2_bn_momentum = 0.5   # > 0  -> BN2 active
    p_dropout = 0.0         # dropout off (identity at inference anyway)
    verbose = False


ARGS = Args()
IN_DIM = ARGS.N_theta * ARGS.N_azimuth * ARGS.N_eccentricity * ARGS.N_phase   # 128
OUT_DIM = ARGS.N_azimuth * ARGS.N_eccentricity                                # 32
BN_EPS = 1e-5
MAX_TILE_ROWS = 2048


def _round_up(x, m):
    return ((x + m - 1) // m) * m


def _num_tensorcores():
    """Best-effort TensorCore-per-chip count (1 on v5e/v6e, 2 on v7x)."""
    try:
        info = pltpu.get_tpu_info()
        for attr in ("num_tensorcores", "tensorcores_per_chip", "num_cores",
                     "cores_per_chip", "core_count"):
            v = getattr(info, attr, None)
            if isinstance(v, int) and 1 <= v <= 8:
                return v
    except Exception:
        pass
    try:
        kind = jax.devices()[0].device_kind.lower()
        if "v7" in kind:
            return 2
    except Exception:
        pass
    return 1


def _choose_tile_b(B, row_mult, num_cores):
    b_up = _round_up(B, row_mult)
    if num_cores <= 1:
        # Single TensorCore: one big tile (up to MAX_TILE_ROWS), no forced split
        # -- splitting small batches only adds per-step pipeline overhead.
        return min(MAX_TILE_ROWS, b_up)
    # Multi-TC (v7x megacore): cap the tile and target >= 2 steps per core so
    # each core's prologue/epilogue DMA can overlap with other steps.
    target_steps = 2 * num_cores
    tile = (b_up // target_steps) // row_mult * row_mult
    return max(row_mult, min(1024, tile))


# ---------------------------------------------------------------------------
# Fused Pallas kernel: Linear+ReLU -> Linear+ReLU -> Linear (BN pre-folded).
# ---------------------------------------------------------------------------
def wherenet_kernel(x_ref, w1_ref, b1_ref, w2_ref, b2_ref, w3_ref, b3_ref, o_ref):
    cdt = w1_ref.dtype  # MXU input dtype (f32, or bf16 when mxu_bf16=True)

    # layer 1: Linear + ReLU   (BN1 folded into W2/b2 on the host)
    x = x_ref[...].astype(cdt)                                           # (TB, IN_DIM)
    h1 = jnp.dot(x, w1_ref[...], preferred_element_type=jnp.float32)    # (TB, dim1)
    h1 = jnp.maximum(h1 + b1_ref[...], 0.0)

    # layer 2: Linear + ReLU   (BN2 folded into W3/b3 on the host)
    h2 = jnp.dot(h1.astype(cdt), w2_ref[...],
                 preferred_element_type=jnp.float32)                     # (TB, dim2)
    h2 = jnp.maximum(h2 + b2_ref[...], 0.0)

    # layer 3: Linear (true OUT_DIM lanes; masked store hides under DMA)
    o = jnp.dot(h2.astype(cdt), w3_ref[...],
                preferred_element_type=jnp.float32)                      # (TB, OUT_DIM)
    o_ref[...] = (o + b3_ref[...]).astype(o_ref.dtype)


def wherenet_forward(image, params, *, tile_b=None, mxu_bf16=False,
                     num_tensorcores=None):
    """Runs the fused WhereNet forward.  image: (B, IN_DIM)."""
    B, F = image.shape
    assert F == IN_DIM

    (w1, b1, s1, t1, w2, b2, s2, t2, w3, b3) = params
    dim1 = w1.shape[1]
    dim2 = w2.shape[1]

    # --- Host-side folding: BN (eval) after ReLU commutes into the next Linear.
    #   relu(.)*s + t  followed by  @W + b   ==   relu(.) @ (diag(s)@W) + (b + t@W)
    w2f = w2 * jnp.reshape(s1, (dim1, 1))
    b2f = b2 + t1 @ w2
    w3f = w3 * jnp.reshape(s2, (dim2, 1))
    b3f = b3 + t2 @ w3

    if mxu_bf16:
        # One-time tiny host cast of the weights; activations are downcast
        # inside the kernel (no extra HBM pass over the image). Biases and
        # MXU accumulation stay f32.  Recommended on v5e (multi-pass f32 MXU).
        w1 = w1.astype(jnp.bfloat16)
        w2f = w2f.astype(jnp.bfloat16)
        w3f = w3f.astype(jnp.bfloat16)

    # --- Batch tile selection (no batch padding; ragged last block is fine
    #     because rows are independent and OOB output rows are discarded).
    row_mult = 16 if image.dtype.itemsize < 4 else 8   # bf16 packs (16,128)/vreg
    if num_tensorcores is None:
        num_tensorcores = _num_tensorcores()
    if tile_b is None:
        tile_b = _choose_tile_b(B, row_mult, num_tensorcores)
    tile_b = max(row_mult, (tile_b // row_mult) * row_mult)

    num_steps = pl.cdiv(B, tile_b)

    # Keep an extra input DMA in flight when there are enough steps to benefit.
    if num_steps >= 3:
        img_spec = pl.BlockSpec((tile_b, IN_DIM), lambda i: (i, 0),
                                pipeline_mode=pl.Buffered(3))
        in_bufs = 3
    else:
        img_spec = pl.BlockSpec((tile_b, IN_DIM), lambda i: (i, 0))
        in_bufs = 2

    def full_spec(shape):
        # Constant-index blocks: same (0, 0) block every grid step, so the
        # pipeline keeps them resident in VMEM (no per-step refetch).
        return pl.BlockSpec(shape, lambda i: (0, 0))

    # VMEM budget from actual element sizes + in-kernel temporaries (h1/h2/o).
    w_bytes = sum(int(a.size) * a.dtype.itemsize
                  for a in (w1, b1, w2f, b2f, w3f, b3f))
    vmem_need = (in_bufs * tile_b * IN_DIM * image.dtype.itemsize
                 + 2 * tile_b * OUT_DIM * 4
                 + 2 * w_bytes
                 + tile_b * (dim1 + dim2 + OUT_DIM) * 4)
    vmem_limit = int(min(48 * 1024 * 1024,
                         max(16 * 1024 * 1024, 2 * vmem_need)))

    out = pl.pallas_call(
        wherenet_kernel,
        out_shape=jax.ShapeDtypeStruct((B, OUT_DIM), jnp.float32),
        grid_spec=pltpu.PrefetchScalarGridSpec(
            num_scalar_prefetch=0,
            grid=(num_steps,),
            in_specs=[
                img_spec,                                            # image tile
                full_spec((IN_DIM, dim1)), full_spec((1, dim1)),     # W1, b1
                full_spec((dim1, dim2)), full_spec((1, dim2)),       # W2', b2'
                full_spec((dim2, OUT_DIM)), full_spec((1, OUT_DIM)), # W3', b3'
            ],
            out_specs=pl.BlockSpec((tile_b, OUT_DIM), lambda i: (i, 0)),
        ),
        compiler_params=pltpu.CompilerParams(
            dimension_semantics=("parallel",),
            vmem_limit_bytes=vmem_limit),
    )(image, w1, b1, w2f, b2f, w3f, b3f)

    return out


# ---------------------------------------------------------------------------
# Deterministic parameter construction (glue, plain JAX).
# ---------------------------------------------------------------------------
def make_params(key):
    ks = jax.random.split(key, 14)

    def lin(kw, kb, fan_in, fan_out):
        bound = 1.0 / jnp.sqrt(fan_in)
        # PyTorch Linear stores (out, in); we keep the transposed (in, out) layout.
        w = jax.random.uniform(kw, (fan_in, fan_out), jnp.float32, -bound, bound)
        b = jax.random.uniform(kb, (1, fan_out), jnp.float32, -bound, bound)
        return w, b

    w1, b1 = lin(ks[0], ks[1], IN_DIM, ARGS.dim1)
    w2, b2 = lin(ks[2], ks[3], ARGS.dim1, ARGS.dim2)
    w3, b3 = lin(ks[4], ks[5], ARGS.dim2, OUT_DIM)

    def bn(kg, kb, km, kv, dim):
        gamma = 1.0 + 0.1 * jax.random.normal(kg, (1, dim), jnp.float32)
        beta = 0.1 * jax.random.normal(kb, (1, dim), jnp.float32)
        rmean = 0.1 * jax.random.normal(km, (1, dim), jnp.float32)
        rvar = 1.0 + 0.1 * jax.random.uniform(kv, (1, dim), jnp.float32)
        scale = gamma / jnp.sqrt(rvar + BN_EPS)
        shift = beta - rmean * scale
        return scale, shift

    s1, t1 = bn(ks[6], ks[7], ks[8], ks[9], ARGS.dim1)
    s2, t2 = bn(ks[10], ks[11], ks[12], ks[13], ARGS.dim2)

    return (w1, b1, s1, t1, w2, b2, s2, t2, w3, b3)


def reference_forward(image, params):
    # Unfolded reference matching the PyTorch module (eval-mode BN).
    (w1, b1, s1, t1, w2, b2, s2, t2, w3, b3) = params
    h1 = jnp.maximum(image @ w1 + b1, 0.0) * s1 + t1
    h2 = jnp.maximum(h1 @ w2 + b2, 0.0) * s2 + t2
    return h2 @ w3 + b3


if __name__ == "__main__":
    key = jax.random.PRNGKey(0)
    k_img, k_par = jax.random.split(key)
    params = make_params(k_par)

    # 1) Small single-tile case.
    B = 8
    image = jax.random.normal(k_img, (B, IN_DIM), jnp.float32)
    out = jax.block_until_ready(wherenet_forward(image, params))
    ref = reference_forward(image, params)
    assert out.shape == (B, OUT_DIM)
    assert jnp.allclose(out, ref, atol=1e-4, rtol=1e-4), "mismatch (B=8)"

    # 2) Default tiling, B not a power of two.
    B2 = 40
    image2 = jax.random.normal(k_img, (B2, IN_DIM), jnp.float32)
    out2 = jax.block_until_ready(wherenet_forward(image2, params))
    ref2 = reference_forward(image2, params)
    assert out2.shape == (B2, OUT_DIM)
    assert jnp.allclose(out2, ref2, atol=1e-4, rtol=1e-4), "mismatch (B=40)"

    # 3) Multi-step grid with a ragged last block (exercises Buffered(3) and
    #    non-multiple-of-8 batch without any host-side padding).
    B3 = 37
    image3 = jax.random.normal(k_img, (B3, IN_DIM), jnp.float32)
    out3 = jax.block_until_ready(wherenet_forward(image3, params, tile_b=16))
    ref3 = reference_forward(image3, params)
    assert out3.shape == (B3, OUT_DIM)
    assert jnp.allclose(out3, ref3, atol=1e-4, rtol=1e-4), "mismatch (B=37, tiled)"

    # 4) Optional bf16-MXU path (v5e relief); looser tolerance by construction.
    out_bf = jax.block_until_ready(wherenet_forward(image2, params, mxu_bf16=True))
    assert out_bf.shape == (B2, OUT_DIM)
    assert jnp.allclose(out_bf, ref2, atol=1e-1, rtol=1e-1), "mismatch (bf16 MXU)"

    print("KERNEL_OK")
</pallas_src>

<mosaic_0001>
module attributes {stable_mosaic.version = 11 : i64} {
  func.func @wherenet_kernel(%arg0: i32, %arg1: memref<8x128xf32, #tpu.memory_space<vmem>>, %arg2: memref<128x64xf32, #tpu.memory_space<vmem>>, %arg3: memref<1x64xf32, #tpu.memory_space<vmem>>, %arg4: memref<64x32xf32, #tpu.memory_space<vmem>>, %arg5: memref<1x32xf32, #tpu.memory_space<vmem>>, %arg6: memref<32x32xf32, #tpu.memory_space<vmem>>, %arg7: memref<1x32xf32, #tpu.memory_space<vmem>>, %arg8: memref<8x32xf32, #tpu.memory_space<vmem>>) attributes {dimension_semantics = [#tpu.dimension_semantics<parallel>], iteration_bounds = array<i64: 1>, scalar_prefetch = 0 : i64, scratch_operands = 0 : i64, tpu.core_type = #tpu.core_type<tc>, window_params = [{transform_indices = @transform_0, window_bounds = array<i64: 8, 128>}, {pipeline_mode = #tpu.pipeline_mode<synchronous>, transform_indices = @transform_1, window_bounds = array<i64: 128, 64>}, {pipeline_mode = #tpu.pipeline_mode<synchronous>, transform_indices = @transform_2, window_bounds = array<i64: 1, 64>}, {pipeline_mode = #tpu.pipeline_mode<synchronous>, transform_indices = @transform_3, window_bounds = array<i64: 64, 32>}, {pipeline_mode = #tpu.pipeline_mode<synchronous>, transform_indices = @transform_4, window_bounds = array<i64: 1, 32>}, {pipeline_mode = #tpu.pipeline_mode<synchronous>, transform_indices = @transform_5, window_bounds = array<i64: 32, 32>}, {pipeline_mode = #tpu.pipeline_mode<synchronous>, transform_indices = @transform_6, window_bounds = array<i64: 1, 32>}, {transform_indices = @transform_7, window_bounds = array<i64: 8, 32>}]} {
    %c0 = arith.constant 0 : index
    %c0_0 = arith.constant 0 : index
    %0 = vector.load %arg1[%c0, %c0_0] : memref<8x128xf32, #tpu.memory_space<vmem>>, vector<8x128xf32>
    %c0_1 = arith.constant 0 : index
    %c0_2 = arith.constant 0 : index
    %1 = vector.load %arg2[%c0_1, %c0_2] : memref<128x64xf32, #tpu.memory_space<vmem>>, vector<128x64xf32>
    %cst = arith.constant dense<0.000000e+00> : vector<8x64xf32>
    %2 = tpu.matmul %0, %1, %cst {dimension_numbers = #tpu.dot_dimension_numbers<[1], [0], [0], [1], [0, 0, 1, 1], [], []>} : vector<8x128xf32>, vector<128x64xf32>, vector<8x64xf32> -> vector<8x64xf32>
    %c0_3 = arith.constant 0 : index
    %c0_4 = arith.constant 0 : index
    %3 = vector.load %arg3[%c0_3, %c0_4] : memref<1x64xf32, #tpu.memory_space<vmem>>, vector<1x64xf32>
    %4 = vector.broadcast %3 : vector<1x64xf32> to vector<8x64xf32>
    %5 = arith.addf %2, %4 : vector<8x64xf32>
    %cst_5 = arith.constant 0.000000e+00 : f32
    %6 = vector.broadcast %cst_5 : f32 to vector<8x64xf32>
    %7 = arith.maximumf %5, %6 : vector<8x64xf32>
    %c0_6 = arith.constant 0 : index
    %c0_7 = arith.constant 0 : index
    %8 = vector.load %arg4[%c0_6, %c0_7] : memref<64x32xf32, #tpu.memory_space<vmem>>, vector<64x32xf32>
    %cst_8 = arith.constant dense<0.000000e+00> : vector<8x32xf32>
    %9 = tpu.matmul %7, %8, %cst_8 {dimension_numbers = #tpu.dot_dimension_numbers<[1], [0], [0], [1], [0, 0, 1, 1], [], []>} : vector<8x64xf32>, vector<64x32xf32>, vector<8x32xf32> -> vector<8x32xf32>
    %c0_9 = arith.constant 0 : index
    %c0_10 = arith.constant 0 : index
    %10 = vector.load %arg5[%c0_9, %c0_10] : memref<1x32xf32, #tpu.memory_space<vmem>>, vector<1x32xf32>
    %11 = vector.broadcast %10 : vector<1x32xf32> to vector<8x32xf32>
    %12 = arith.addf %9, %11 : vector<8x32xf32>
    %cst_11 = arith.constant 0.000000e+00 : f32
    %13 = vector.broadcast %cst_11 : f32 to vector<8x32xf32>
    %14 = arith.maximumf %12, %13 : vector<8x32xf32>
    %c0_12 = arith.constant 0 : index
    %c0_13 = arith.constant 0 : index
    %15 = vector.load %arg6[%c0_12, %c0_13] : memref<32x32xf32, #tpu.memory_space<vmem>>, vector<32x32xf32>
    %cst_14 = arith.constant dense<0.000000e+00> : vector<8x32xf32>
    %16 = tpu.matmul %14, %15, %cst_14 {dimension_numbers = #tpu.dot_dimension_numbers<[1], [0], [0], [1], [0, 0, 1, 1], [], []>} : vector<8x32xf32>, vector<32x32xf32>, vector<8x32xf32> -> vector<8x32xf32>
    %c0_15 = arith.constant 0 : index
    %c0_16 = arith.constant 0 : index
    %17 = vector.load %arg7[%c0_15, %c0_16] : memref<1x32xf32, #tpu.memory_space<vmem>>, vector<1x32xf32>
    %18 = vector.broadcast %17 : vector<1x32xf32> to vector<8x32xf32>
    %19 = arith.addf %16, %18 : vector<8x32xf32>
    %c0_17 = arith.constant 0 : index
    %c0_18 = arith.constant 0 : index
    %20 = vector.load %arg8[%c0_17, %c0_18] : memref<8x32xf32, #tpu.memory_space<vmem>>, vector<8x32xf32>
    tpu.vector_store %arg8[%c0_17, %c0_18], %19 {strides = array<i32>} : memref<8x32xf32, #tpu.memory_space<vmem>>, vector<8x32xf32>,
    return
  }
  func.func @transform_0(%arg0: i32) -> (i32, i32) {
    %c0_i32 = arith.constant 0 : i32
    %c0_i32_0 = arith.constant 0 : i32
    return %arg0, %c0_i32 : i32, i32
  }
  func.func @transform_1(%arg0: i32) -> (i32, i32) {
    %c0_i32 = arith.constant 0 : i32
    %c0_i32_0 = arith.constant 0 : i32
    %c0_i32_1 = arith.constant 0 : i32
    return %c0_i32, %c0_i32_0 : i32, i32
  }
  func.func @transform_2(%arg0: i32) -> (i32, i32) {
    %c0_i32 = arith.constant 0 : i32
    %c0_i32_0 = arith.constant 0 : i32
    %c0_i32_1 = arith.constant 0 : i32
    return %c0_i32, %c0_i32_0 : i32, i32
  }
  func.func @transform_3(%arg0: i32) -> (i32, i32) {
    %c0_i32 = arith.constant 0 : i32
    %c0_i32_0 = arith.constant 0 : i32
    %c0_i32_1 = arith.constant 0 : i32
    return %c0_i32, %c0_i32_0 : i32, i32
  }
  func.func @transform_4(%arg0: i32) -> (i32, i32) {
    %c0_i32 = arith.constant 0 : i32
    %c0_i32_0 = arith.constant 0 : i32
    %c0_i32_1 = arith.constant 0 : i32
    return %c0_i32, %c0_i32_0 : i32, i32
  }
  func.func @transform_5(%arg0: i32) -> (i32, i32) {
    %c0_i32 = arith.constant 0 : i32
    %c0_i32_0 = arith.constant 0 : i32
    %c0_i32_1 = arith.constant 0 : i32
    return %c0_i32, %c0_i32_0 : i32, i32
  }
  func.func @transform_6(%arg0: i32) -> (i32, i32) {
    %c0_i32 = arith.constant 0 : i32
    %c0_i32_0 = arith.constant 0 : i32
    %c0_i32_1 = arith.constant 0 : i32
    return %c0_i32, %c0_i32_0 : i32, i32
  }
  func.func @transform_7(%arg0: i32) -> (i32, i32) {
    %c0_i32 = arith.constant 0 : i32
    %c0_i32_0 = arith.constant 0 : i32
    return %arg0, %c0_i32 : i32, i32
  }
}

</mosaic_0001>

<bundles_post_ra>
// kernel: tpu_custom_call.1
= control target key start
LH: loop header
LB: loop body
LE: loop exit
PB: predicated region body
PF: predicated region fallthrough
CT: control target
= control target key end

     0   :  { %v438_v1 = vmov 0.0   ;;  %vm439_vm0 = vmmov 0   ;;  %s614_s0 = inlined_call_operand.vmem [shape: f32[8,128], index: 0, kind: input, shape index: {}]   ;;  %s615_s1 = inlined_call_operand.vmem [shape: f32[128,64], index: 1, kind: input, shape index: {}]   ;;  %s616_s2 = inlined_call_operand.vmem [shape: f32[1,64], index: 2, kind: input, shape index: {}]   ;;  %s617_s3 = inlined_call_operand.vmem [shape: f32[64,32], index: 3, kind: input, shape index: {}]   ;;  %s618_s4 = inlined_call_operand.vmem [shape: f32[1,32], index: 4, kind: input, shape index: {}]   ;;  %s619_s5 = inlined_call_operand.vmem [shape: f32[32,32], index: 5, kind: input, shape index: {}]   ;;  %s620_s6 = inlined_call_operand.vmem [shape: f32[1,32], index: 6, kind: input, shape index: {}]   ;;  %s621_s7 = inlined_call_operand.hbm [shape: f32[8,32], index: 7, kind: output, shape index: {}]  }
   0x1   :  { %v43_v0 = vld [vmem:[%s615_s1 + $0x78] sm:$0xff]  ;;  %348 = vmatprep.subr.mxu0 %v438_v1  ;;  %v42_v2 = vld [vmem:[%s615_s1 + $0x70] sm:$0xff]  ;;  %380 = vmatprep.mubr.msk.f32.mxu0 %vm439_vm0, %v438_v1  ;;  %v41_v3 = vld [vmem:[%s615_s1 + $0x68] sm:$0xff] }
   0x2   :  { %349 = vmatpush3.msra.mxu0 %v43_v0  ;;  %383 = vmatprep.subr.mxu1 %v438_v1  ;;  %v40_v4 = vld [vmem:[%s615_s1 + $0x60] sm:$0xff]  ;;  %v129_v5 = vld [vmem:[%s617_s3 + $0x38] sm:$0xff]  ;;  %v128_v6 = vld [vmem:[%s617_s3 + $0x30] sm:$0xff] }
   0x3   :  { %350 = vmatprep.subr.mxu0 %v438_v1  ;;  %399 = vmatprep.mubr.msk.f32.mxu1 %vm439_vm0, %v438_v1  ;;  %v39_v7 = vld [vmem:[%s615_s1 + $0x58] sm:$0xff]  ;;  %v127_v8 = vld [vmem:[%s617_s3 + $0x28] sm:$0xff] }
   0x4   :  { %351 = vmatpush3.msra.mxu0 %v42_v2  ;;  %384 = vmatpush3.msra.mxu1 %v129_v5 }
   0x5   :  { %352 = vmatprep.subr.mxu0 %v438_v1  ;;  %385 = vmatprep.subr.mxu1 %v438_v1 }
   0x6   :  { %353 = vmatpush3.msra.mxu0 %v41_v3 }
   0x7   :  { %354 = vmatprep.subr.mxu0 %v438_v1 }
   0x8   :  { %12 = vsyncpa [#allocation3], 0  ;;  %355 = vmatpush3.msra.mxu0 %v40_v4  ;;  %386 = vmatpush3.msra.mxu1 %v128_v6  ;;  %v38_v9 = vld [vmem:[%s615_s1 + $0x50] sm:$0xff]  ;;  %v126_v10 = vld [vmem:[%s617_s3 + $0x20] sm:$0xff]  ;;  %vm137_vm1 = vcmask 523264   ;;  %vm223_vm2 = vcmask 261120  }
   0x9   :  { %356 = vmatprep.subr.mxu0 %v438_v1  ;;  %387 = vmatprep.subr.mxu1 %v438_v1  ;;  %v37_v11 = vld [vmem:[%s615_s1 + $0x48] sm:$0xff]  ;;  %v125_v12 = vld [vmem:[%s617_s3 + $0x18] sm:$0xff]  ;;  %v36_v13 = vld [vmem:[%s615_s1 + $0x40] sm:$0xff]  ;;  %s440_s15 = smov [#allocation2]  }
   0xa   :  { %357 = vmatpush3.msra.mxu0 %v39_v7  ;;  %388 = vmatpush3.msra.mxu1 %v127_v8  ;;  %v35_v14 = vld [vmem:[%s615_s1 + $0x38] sm:$0xff]  ;;  %v34_v15 = vld [vmem:[%s615_s1 + $0x30] sm:$0xff]  ;;  %v33_v16 = vld [vmem:[%s615_s1 + $0x28] sm:$0xff]  ;;  %s304_s16 = sshll.u32 %s440_s15, 4  ;;  %s305_s16 = int_to_ptr.vmem [resolvable:$true] %s304_s16 }
   0xb   :  { %358 = vmatprep.subr.mxu0 %v438_v1  ;;  %389 = vmatprep.subr.mxu1 %v438_v1  ;;  %v32_v17 = vld [vmem:[%s615_s1 + $0x20] sm:$0xff]  ;;  %v31_v18 = vld [vmem:[%s615_s1 + $0x18] sm:$0xff]  ;;  %v30_v19 = vld [vmem:[%s615_s1 + $0x10] sm:$0xff]  ;;  %p421_p1 = scmp.lt.s32.totalorder %s305_s16, %s305_s16 }
   0xc   :  { %359 = vmatpush3.msra.mxu0 %v38_v9  ;;  %390 = vmatpush3.msra.mxu1 %v126_v10  ;;  %v29_v20 = vld [vmem:[%s615_s1 + $0x8] sm:$0xff]  ;;  %v28_v21 = vld [vmem:[%s615_s1] sm:$0xff]  ;;  %v124_v23 = vld [vmem:[%s617_s3 + $0x10] sm:$0xff] }
   0xd   :  { %360 = vmatprep.subr.mxu0 %v438_v1  ;;  %391 = vmatprep.subr.mxu1 %v438_v1  ;;  %v27_v22 = vld [vmem:[%s614_s0] sm:$0xff]  ;;  %v123_v24 = vld [vmem:[%s617_s3 + $0x8] sm:$0xff]  ;;  %v215_v31 = vld [vmem:[%s619_s5 + $0x18] sm:$0xff] }
   0xe   :  { %361 = vmatpush3.msra.mxu0 %v37_v11  ;;  %392 = vmatpush3.msra.mxu1 %v125_v12  ;;  %v122_v25 = vld [vmem:[%s617_s3] sm:$0xff]  ;;  %v214_v32 = vld [vmem:[%s619_s5 + $0x10] sm:$0xff]  ;;  %v213_v33 = vld [vmem:[%s619_s5 + $0x8] sm:$0xff] }
   0xf   :  { %362 = vmatprep.subr.mxu0 %v438_v1  ;;  %393 = vmatprep.subr.mxu1 %v438_v1  ;;  %v312_v26 = vld [vmem:[%s616_s2] ss:$0 sm:$0xff] }
  0x10   :  { %363 = vmatpush3.msra.mxu0 %v36_v13  ;;  %394 = vmatpush3.msra.mxu1 %v124_v23  ;;  %v212_v34 = vld [vmem:[%s619_s5] sm:$0xff]  ;;  %s416_s5 = scalar_lea.vmem %s305_s16, 128 }
  0x11   :  { %364 = vmatprep.subr.mxu0 %v438_v1  ;;  %395 = vmatprep.subr.mxu1 %v438_v1  ;;  %v313_v35 = vld [vmem:[%s618_s4] ss:$0 sm:$0xff]  ;;  %p417_p0 = scmp.ne.s32.totalorder %s305_s16, %s416_s5  ;;  %p422_p2 = scmp.lt.s32.totalorder %s416_s5, %s416_s5 }
  0x12   :  { %365 = vmatpush3.msra.mxu0 %v35_v14  ;;  %396 = vmatpush3.msra.mxu1 %v123_v24  ;;  %v315_v40 = vld [vmem:[%s620_s6] ss:$0 sm:$0xff] }
  0x13   :  { %366 = vmatprep.subr.mxu0 %v438_v1  ;;  %397 = vmatprep.subr.mxu1 %v438_v1  ;;  %p423_p3 = por %p422_p2, %p421_p1 }
  0x14   :  { %367 = vmatpush3.msra.mxu0 %v34_v15  ;;  %398 = vmatpush3.msra.mxu1 %v122_v25 }
  0x15   :  { %368 = vmatprep.subr.mxu0 %v438_v1  ;;  %402 = vmatprep.subr.mxu1 %v438_v1  ;;  %p424_p4 = pnand %p423_p3, %p417_p0 }
  0x16   :  { %369 = vmatpush3.msra.mxu0 %v33_v16 }
  0x17   :  { %370 = vmatprep.subr.mxu0 %v438_v1 }
  0x18   :  { %371 = vmatpush3.msra.mxu0 %v32_v17 }
  0x19   :  { %372 = vmatprep.subr.mxu0 %v438_v1 }
  0x1a   :  { %373 = vmatpush3.msra.mxu0 %v31_v18 }
  0x1b   :  { %374 = vmatprep.subr.mxu0 %v438_v1 }
  0x1c   :  { %375 = vmatpush3.msra.mxu0 %v30_v19 }
  0x1d   :  { %376 = vmatprep.subr.mxu0 %v438_v1 }
  0x1e   :  { %377 = vmatpush3.msra.mxu0 %v29_v20 }
  0x1f   :  { %378 = vmatprep.subr.mxu0 %v438_v1 }
  0x20   :  { %379 = vmatpush3.msra.mxu0 %v28_v21 }
  0x21   :  { %381 = vmatmul.mubr.f32.vlgmr.msra.gmra.mxu0 %v27_v22 }
  0xe1   :  { %v117_v27 = vpop.f32.mrf.mxu0 }
  0xe2   :  { %v118_v28 = vadd.f32 %v312_v26, %v117_v27 }
  0xe3   :  { %v382_v29 = vpop.f32.mrf.mxu0 }
  0xe4   :  { %v121_v30 = vmax.f32 %v118_v28, 0.0 }
  0xe6   :  { %400 = vmatmul.mubr.msk.f32.vlgmr.msra.gmra.mxu1 %vm137_vm1, %v121_v30 }
  0xe7   :  { %403 = vmatpush3.msra.mxu1 %v215_v31  ;;  %410 = vmatprep.mubr.msk.f32.mxu1 %vm439_vm0, %v438_v1 }
  0xe8   :  { %404 = vmatprep.subr.mxu1 %v438_v1 }
  0xe9   :  { %405 = vmatpush3.msra.mxu1 %v214_v32 }
  0xea   :  { %406 = vmatprep.subr.mxu1 %v438_v1 }
  0xeb   :  { %407 = vmatpush3.msra.mxu1 %v213_v33 }
  0xec   :  { %408 = vmatprep.subr.mxu1 %v438_v1 }
  0xed   :  { %409 = vmatpush3.msra.mxu1 %v212_v34 }
 0x1a6   :  { %v207_v36 = vpop.f32.mrf.mxu1 }
 0x1a7   :  { %v208_v37 = vadd.f32 %v313_v35, %v207_v36 }
 0x1a8   :  { %v401_v38 = vpop.f32.mrf.mxu1 }
 0x1a9   :  { %v211_v39 = vmax.f32 %v208_v37, 0.0 }
 0x1ab   :  { %411 = vmatmul.mubr.msk.f32.vlgmr.msra.gmra.mxu1 %vm223_vm2, %v211_v39 }
 0x26b   :  { %v293_v41 = vpop.f32.mrf.mxu1 }
 0x26c   :  { %v294_v42 = vadd.f32 %v315_v40, %v293_v41 }
 0x26d   :  { %v412_v43 = vpop.f32.mrf.mxu1 }
 0x26e   :  { %297 = vst.msk [vmem:[#allocation2] sm:$0xff] %vm223_vm2, %v294_v42 }
 0x26f   :  { %427 = shalt.err (!%p424_p4)
}
 0x270   :  { %307 = dma.vmem_to_hbm [thread:$0]  %s305_s16, 128, %s621_s7, [#allocation3]  }
 0x271   :  { %436 = dma.done.wait [#allocation3], 128  }
 0x272   :  { %437 = vsyncadd [#allocation3], 4294967168 }
 0x273   :  { %311 = vsyncpa [#allocation3], 1 }

</bundles_post_ra>
